<compile_context>
chip_gen: v7x
topology: tpu7x:2x2x1
jax: 0.10.0
libtpu: 0.0.40
codegen_flags: <defaults>
</compile_context>

<pallas_src>
import functools

import jax
import jax.numpy as jnp
from jax import lax
from jax.experimental import pallas as pl
from jax.experimental.pallas import tpu as pltpu


def _round_up(x, m):
    return ((x + m - 1) // m) * m


def _vmem_capacity_bytes():
    try:
        return int(pltpu.get_tpu_info().vmem_capacity_bytes)
    except Exception:
        return 64 * 1024 * 1024  # conservative (v7x per-core VMEM)


def _pool_sum_kernel(x_ref, sum_ref):
    # x_ref: (B*C, TQ) f32 tile; sum_ref: (B*C, 1) f32 resident accumulator.
    @pl.when(pl.program_id(0) == 0)
    def _():
        sum_ref[...] = jnp.zeros_like(sum_ref)

    sum_ref[...] = sum_ref[...] + jnp.sum(x_ref[...], axis=-1, keepdims=True)


def _sample_kernel(theta_ref, bx_ref, by_ref, qx_ref, qy_ref, img_ref, out_ref,
                   *, Hin, Win, C):
    # Separable bilinear grid_sample (zeros padding, align_corners=False):
    #   out[c, p] = sum_h ay[h, p] * (sum_w img[c, h, w] * ax[w, p])
    # with triangle weights ax = max(0, 1 - |w - sx[p]|), ay = max(0, 1 - |h - sy[p]|).
    b = pl.program_id(0)
    t00 = theta_ref[b * 6 + 0]
    t01 = theta_ref[b * 6 + 1]
    t02 = theta_ref[b * 6 + 2]
    t10 = theta_ref[b * 6 + 3]
    t11 = theta_ref[b * 6 + 4]
    t12 = theta_ref[b * 6 + 5]

    bx = bx_ref[...]                        # (1, TP) lane-dense output-pixel coords
    by = by_ref[...]
    gx = t00 * bx + t01 * by + t02          # F.affine_grid (align_corners=False)
    gy = t10 * bx + t11 * by + t12
    sx = ((gx + 1.0) * Win - 1.0) * 0.5     # source coords in input pixels
    sy = ((gy + 1.0) * Hin - 1.0) * 0.5

    # Triangle tap weights == bilinear taps incl. zeros padding (out-of-range taps
    # get weight 0; zero-padded slab rows/cols contribute nothing).  f32 math,
    # single bf16 cast of the MXU operand.
    ax = jnp.maximum(1.0 - jnp.abs(qx_ref[...] - sx), 0.0).astype(jnp.bfloat16)  # (Wp, TP)
    ay = jnp.maximum(1.0 - jnp.abs(qy_ref[...] - sy), 0.0)                       # (Hp, TP) f32

    rows = []
    for c in range(C):  # C is small and static; per-channel 2-D MXU matmuls
        xc = jnp.dot(img_ref[0, c], ax, preferred_element_type=jnp.float32)  # (Hp, TP)
        rows.append(jnp.sum(xc * ay, axis=0, keepdims=True))                 # (1, TP)
    out_ref[0] = jnp.concatenate(rows, axis=0)                               # (C, TP)


def stn_forward(x, params, out_size, detach=True):
    """Returns (cropped_img NCHW, theta (B, 2, 3)) mirroring STN.forward."""
    B, C, H, W = x.shape
    Hout, Wout = out_size
    w1, b1, w2, b2 = params

    Q = H * W            # input pixels
    P = Hout * Wout      # output pixels
    vmem_cap = _vmem_capacity_bytes()
    big_vmem = vmem_cap >= 96 * 1024 * 1024     # v5e/v6e: 128 MiB, v7x: 64 MiB

    # ---- localization: sublane-packed GAP kernel + tiny Linears in plain JAX ----
    TQ = min(_round_up(Q, 128), 2048 if big_vmem else 1024)
    Qp = _round_up(Q, TQ)
    nQ = Qp // TQ
    BC = B * C
    loc_in = lax.stop_gradient(x) if detach else x           # mirrors x.detach()
    loc_slab = loc_in.reshape(BC, Q).astype(jnp.float32)
    if Qp != Q:
        loc_slab = jnp.pad(loc_slab, ((0, 0), (0, Qp - Q)))
    pooled_sum = pl.pallas_call(
        _pool_sum_kernel,
        grid=(nQ,),
        in_specs=[pl.BlockSpec((BC, TQ), lambda q: (0, q))],
        out_specs=pl.BlockSpec((BC, 1), lambda q: (0, 0)),
        out_shape=jax.ShapeDtypeStruct((BC, 1), jnp.float32),
        compiler_params=pltpu.CompilerParams(dimension_semantics=("arbitrary",)),
    )(loc_slab)
    pooled = pooled_sum.reshape(B, C) * (1.0 / Q)            # (B, C)
    xs = jnp.maximum(pooled @ w1 + b1, 0.0)                  # L_net tail: Linear + ReLU
    theta = xs @ w2 + b2                                     # fc_loc -> (B, 6)
    theta_smem = theta.reshape(B * 6)

    # ---- sampler tiling (separable bilinear) ----
    Hp = _round_up(H, 8)
    Wp = _round_up(W, 128)
    TP = min(_round_up(P, 128), 1024 if big_vmem else 512)
    Pp = _round_up(P, TP)
    nP = Pp // TP
    if B * nP < 2 and P > 128:                               # v7x megacore balance
        TP = _round_up((P + 1) // 2, 128)
        Pp = _round_up(P, TP)
        nP = Pp // TP

    img = x.astype(jnp.bfloat16)                             # MXU operand
    if (Hp, Wp) != (H, W):
        img = jnp.pad(img, ((0, 0), (0, 0), (0, Hp - H), (0, Wp - W)))

    # theta-independent geometry, computed once in the wrapper
    p_idx = jnp.arange(Pp, dtype=jnp.int32)
    oi = (p_idx // Wout).astype(jnp.float32)                 # output row
    oj = (p_idx % Wout).astype(jnp.float32)                  # output col
    base_x = ((2.0 * oj + 1.0 - Wout) / Wout).reshape(1, Pp)  # align_corners=False
    base_y = ((2.0 * oi + 1.0 - Hout) / Hout).reshape(1, Pp)
    qx_f = jnp.arange(Wp, dtype=jnp.float32).reshape(Wp, 1)   # input col index
    qy_f = jnp.arange(Hp, dtype=jnp.float32).reshape(Hp, 1)   # input row index

    # Real VMEM footprint (double-buffered blocks + in-kernel rank-2 temps); only
    # raise the scoped limit when we actually need more than the 32 MiB default,
    # and never request more than 3/4 of physical VMEM (v7x headroom).
    need = 2 * (C * Hp * Wp * 2 + 2 * TP * 4 + (Wp + Hp) * 4 + C * TP * 4)
    need += Wp * TP * 2 + 3 * Hp * TP * 4
    need = int(need * 1.5) + (2 << 20)
    cp_kwargs = dict(dimension_semantics=("parallel", "parallel"))
    if need > 32 * 1024 * 1024:
        cp_kwargs["vmem_limit_bytes"] = min(need, (vmem_cap * 3) // 4)

    kernel = functools.partial(_sample_kernel, Hin=float(H), Win=float(W), C=C)
    out_flat = pl.pallas_call(
        kernel,
        grid=(B, nP),
        in_specs=[
            pl.BlockSpec(memory_space=pltpu.MemorySpace.SMEM),      # theta (B*6,)
            pl.BlockSpec((1, TP), lambda b, p: (0, p)),             # base_x
            pl.BlockSpec((1, TP), lambda b, p: (0, p)),             # base_y
            pl.BlockSpec((Wp, 1), lambda b, p: (0, 0)),             # qx (f32 col idx)
            pl.BlockSpec((Hp, 1), lambda b, p: (0, 0)),             # qy (f32 row idx)
            pl.BlockSpec((1, C, Hp, Wp), lambda b, p: (b, 0, 0, 0)),  # image slab (bf16)
        ],
        out_specs=pl.BlockSpec((1, C, TP), lambda b, p: (b, 0, p)),
        out_shape=jax.ShapeDtypeStruct((B, C, Pp), jnp.float32),
        compiler_params=pltpu.CompilerParams(**cp_kwargs),
    )(theta_smem, base_x, base_y, qx_f, qy_f, img)

    out = out_flat[:, :, :P].reshape(B, C, Hout, Wout)
    return out, lax.stop_gradient(theta.reshape(B, 2, 3))   # forward returns theta.detach()


if __name__ == "__main__":
    key = jax.random.PRNGKey(0)
    B, C, H, W = 2, 4, 16, 16
    L_channels = 32
    out_size = (8, 8)

    k_x, k_w1 = jax.random.split(key)
    x = jax.random.normal(k_x, (B, C, H, W), dtype=jnp.float32)

    # L_net params (weights stored as (in, out), equivalent to PyTorch x @ W.T)
    w1 = 0.1 * jax.random.normal(k_w1, (C, L_channels), dtype=jnp.float32)
    b1 = jnp.zeros((1, L_channels), jnp.float32)
    # fc_loc: 'zeros' init, bias = theta_0 (identity affine transform)
    w2 = jnp.zeros((L_channels, 6), jnp.float32)
    b2 = jnp.array([[1.0, 0.0, 0.0, 0.0, 1.0, 0.0]], jnp.float32)

    out, theta = stn_forward(x, (w1, b1, w2, b2), out_size, detach=True)
    jax.block_until_ready((out, theta))

    assert out.shape == (B, C, out_size[0], out_size[1])
    assert theta.shape == (B, 2, 3)
    assert bool(jnp.all(jnp.isfinite(out)))
    print("KERNEL_OK")
</pallas_src>

<mosaic_0001>
module attributes {stable_mosaic.version = 11 : i64} {
  func.func @_pool_sum_kernel(%arg0: i32, %arg1: memref<8x256xf32, #tpu.memory_space<vmem>>, %arg2: memref<8x1xf32, #tpu.memory_space<vmem>>) attributes {dimension_semantics = [#tpu.dimension_semantics<arbitrary>], iteration_bounds = array<i64: 1>, scalar_prefetch = 0 : i64, scratch_operands = 0 : i64, tpu.core_type = #tpu.core_type<tc>, window_params = [{transform_indices = @transform_0, window_bounds = array<i64: 8, 256>}, {pipeline_mode = #tpu.pipeline_mode<synchronous>, transform_indices = @transform_1, window_bounds = array<i64: 8, 1>}]} {
    %c0_i32 = arith.constant 0 : i32
    %0 = arith.cmpi eq, %arg0, %c0_i32 : i32
    %1 = arith.extui %0 : i1 to i32
    %c0_i32_0 = arith.constant 0 : i32
    %2 = arith.cmpi ne, %1, %c0_i32_0 : i32
    scf.if %2 {
      %cst_6 = arith.constant 0.000000e+00 : f32
      %9 = vector.broadcast %cst_6 : f32 to vector<8x1xf32>
      %c0_7 = arith.constant 0 : index
      %c0_8 = arith.constant 0 : index
      %10 = vector.load %arg2[%c0_7, %c0_8] : memref<8x1xf32, #tpu.memory_space<vmem>>, vector<8x1xf32>
      tpu.vector_store %arg2[%c0_7, %c0_8], %9 {strides = array<i32>} : memref<8x1xf32, #tpu.memory_space<vmem>>, vector<8x1xf32>,
    } else {
    }
    %c0 = arith.constant 0 : index
    %c0_1 = arith.constant 0 : index
    %3 = vector.load %arg2[%c0, %c0_1] : memref<8x1xf32, #tpu.memory_space<vmem>>, vector<8x1xf32>
    %c0_2 = arith.constant 0 : index
    %c0_3 = arith.constant 0 : index
    %4 = vector.load %arg1[%c0_2, %c0_3] : memref<8x256xf32, #tpu.memory_space<vmem>>, vector<8x256xf32>
    %cst = arith.constant dense<0.000000e+00> : vector<8xf32>
    %5 = vector.multi_reduction <add>, %4, %cst [1] : vector<8x256xf32> to vector<8xf32>
    %6 = vector.shape_cast %5 : vector<8xf32> to vector<8x1xf32>
    %7 = arith.addf %3, %6 : vector<8x1xf32>
    %c0_4 = arith.constant 0 : index
    %c0_5 = arith.constant 0 : index
    %8 = vector.load %arg2[%c0_4, %c0_5] : memref<8x1xf32, #tpu.memory_space<vmem>>, vector<8x1xf32>
    tpu.vector_store %arg2[%c0_4, %c0_5], %7 {strides = array<i32>} : memref<8x1xf32, #tpu.memory_space<vmem>>, vector<8x1xf32>,
    return
  }
  func.func @transform_0(%arg0: i32) -> (i32, i32) {
    %c0_i32 = arith.constant 0 : i32
    %c0_i32_0 = arith.constant 0 : i32
    return %c0_i32, %arg0 : i32, i32
  }
  func.func @transform_1(%arg0: i32) -> (i32, i32) {
    %c0_i32 = arith.constant 0 : i32
    %c0_i32_0 = arith.constant 0 : i32
    %c0_i32_1 = arith.constant 0 : i32
    return %c0_i32, %c0_i32_0 : i32, i32
  }
}

</mosaic_0001>

<bundles_post_ra>
// kernel: tpu_custom_call.1
= control target key start
LH: loop header
LB: loop body
LE: loop exit
PB: predicated region body
PF: predicated region fallthrough
CT: control target
= control target key end

     0   :  { %6 = vsyncpa [#allocation3], 0  ;;  %s66_s6 = smov [#allocation2]   ;;  %s99_s0 = inlined_call_operand.hbm [shape: f32[8,256], index: 0, kind: input, shape index: {}]   ;;  %s100_s1 = inlined_call_operand.vmem [shape: f32[8,1], index: 1, kind: output, shape index: {}]  }
   0x1   :  { %s13_s7 = sshll.u32 %s66_s6, 4  ;;  %s42_s10 = scalar_lea.hbm %s99_s0, 256  ;;  %s14_s7 = int_to_ptr.vmem [resolvable:$true] %s13_s7 }
   0x2   :  { %p43_p0 = scmp.ne.s32.totalorder %s99_s0, %s42_s10  ;;  %p46_p1 = scmp.lt.u32.totalorder %s42_s10, %s99_s0 }
   0x4   :  { %p48_p2 = pnand %p46_p1, %p43_p0 }
   0x6   :  { %51 = shalt.err (!%p48_p2)
}
   0x7   :  { %s52_s15 = scalar_lea.vmem %s14_s7, 256  ;;  %p57_p4 = scmp.lt.s32.totalorder %s14_s7, %s14_s7 }
   0x8   :  { %p53_p3 = scmp.ne.s32.totalorder %s14_s7, %s52_s15  ;;  %p58_p5 = scmp.lt.s32.totalorder %s52_s15, %s52_s15 }
   0xa   :  { %p59_p6 = por %p58_p5, %p57_p4 }
   0xc   :  { %p60_p7 = pnand %p59_p6, %p53_p3 }
   0xe   :  { %63 = shalt.err (!%p60_p7)
}
   0xf   :  { %16 = dma.hbm_to_vmem [thread:$0]  %s99_s0, 256, %s14_s7, [#allocation3]  }
  0x10   :  { %64 = dma.done.wait [#allocation3], 256  }
  0x11   :  { %65 = vsyncadd [#allocation3], 4294967040  ;;  %vm24_vm0 = vcmask 7168   ;;  %v67_v0 = vmov 0.0   ;;  %v27_v1 = vld [vmem:[#allocation2] sm:$0xff]  ;;  %v28_v2 = vld [vmem:[#allocation2 + $0x8] sm:$0xff] }
  0x12   :  { %25 = vst.msk [vmem:[%s100_s1] sm:$0xff] %vm24_vm0, %v67_v0  ;;  %v29_v3 = vadd.f32 %v28_v2, %v27_v1 }
  0x14   :  { %30 = vadd.xlane.f32.xlu0 %v29_v3 }
  0x19   :  { %v26_v4 = vld [vmem:[%s100_s1] sm:$0xff] }
  0xa1   :  { %v31_v5 = vpop.xlane.xlu0 %30 }
  0xa2   :  { %v32_v6 = vadd.f32 %v31_v5, %v26_v4 }
  0xa4   :  { %34 = vst.msk [vmem:[%s100_s1] sm:$0xff] %vm24_vm0, %v32_v6 }
  0xa5   :  { %39 = vsyncpa [#allocation3], 1 }

</bundles_post_ra>
